<compile_context>
chip_gen: v5e
topology: v5e:2x2
jax: 0.10.0
libtpu: 0.0.40
codegen_flags: <defaults>
</compile_context>

<pallas_src>
import numpy as np

import jax
import jax.numpy as jnp
from jax.experimental import pallas as pl
from jax.experimental.pallas import tpu as pltpu


def _drop_path_kernel(x_ref, s_ref, o_ref):
    # x_ref: (TB, TD) data block; s_ref: (TB, 1) per-row scale
    # (0.0 for dropped samples, 1/keep_prob -- or 1.0 -- for kept samples).
    o_ref[...] = x_ref[...] * s_ref[...]


def _drop_path_residual_kernel(x_ref, r_ref, s_ref, o_ref):
    # Fused residual add: o = residual + drop_path(x).
    o_ref[...] = r_ref[...] + x_ref[...] * s_ref[...]


def _round_down(n, m):
    return max(m, (n // m) * m)


def _round_up(n, m):
    return ((n + m - 1) // m) * m


def _vmem_budgets(n_big_streams):
    """Generation-aware scoped-VMEM limit and per-block byte budget."""
    try:
        capacity = int(pltpu.get_tpu_info().vmem_capacity_bytes)
    except Exception:
        capacity = 64 << 20  # conservative (v7x-sized) fallback
    # Leave headroom under physical VMEM: ~48 MiB on v7x (64 MiB phys),
    # 96 MiB on v5e/v6e (128 MiB phys).
    vmem_limit = min((capacity * 3) // 4, 96 << 20)
    # Double-buffered footprint ~= 2 * n_big_streams * block_budget; keep it
    # comfortably under the limit and cap blocks at 8 MiB (past ~2 MiB the
    # ~0.35us/step grid overhead is already amortized on every generation).
    block_budget = min(vmem_limit // (2 * n_big_streams + 2), 8 << 20)
    return vmem_limit, block_budget


def _pick_tiles(B, D, itemsize, block_budget, min_steps=2):
    # Lane-dense column tile: multiple of 128 (cdiv handles a ragged tail),
    # or the full dim when D is small/unaligned (always legal).
    if D % 128 == 0:
        TD = min(D, 2048)
    elif D <= 2048:
        TD = D
    else:
        TD = 2048
    # Sublane-packed row tile sized by the per-block byte budget.
    TB_max = _round_down(block_budget // max(1, TD * itemsize), 8)
    TB = min(TB_max, _round_up(B, 8))

    # Guarantee >= min_steps grid steps so v7x can shard the parallel axes
    # across both TensorCores (no effect on single-TC v5e/v6e).
    def steps(tb, td):
        return pl.cdiv(B, tb) * pl.cdiv(D, td)

    while steps(TB, TD) < min_steps:
        if TD >= 256:
            TD = _round_down(TD // 2, 128)
        elif TB >= 16:
            TB = _round_down(TB // 2, 8)
        else:
            break
    return TB, TD


def drop_path_pallas(x, key, drop_prob: float = 0.0, training: bool = False,
                     scale_by_keep: bool = True, residual=None):
    """JAX/Pallas equivalent of timm's drop_path().

    If `residual` is given, computes `residual + drop_path(x)` in one fused
    pass (saves one full HBM round trip for the standard residual pattern).
    """
    if drop_prob == 0.0 or not training:
        return x if residual is None else residual + x
    keep_prob = 1.0 - drop_prob

    B = x.shape[0]
    D = int(np.prod(x.shape[1:]))  # flatten non-batch dims -> lane-dense
    x2 = x.reshape(B, D)

    # Per-sample bernoulli keep decision, computed once outside the grid
    # (matches torch's x.new_empty((B,1,...)).bernoulli_(keep_prob)).
    keep = jax.random.bernoulli(key, p=keep_prob, shape=(B,)).astype(jnp.float32)
    if scale_by_keep and keep_prob > 0.0:
        scale = keep * jnp.float32(1.0 / keep_prob)
    else:
        scale = keep
    scale2 = scale.reshape(B, 1).astype(x.dtype)  # pre-cast: no per-block cast

    itemsize = jnp.dtype(x.dtype).itemsize
    n_big = 2 if residual is None else 3
    vmem_limit, block_budget = _vmem_budgets(n_big)
    TB, TD = _pick_tiles(B, D, itemsize, block_budget)
    grid = (pl.cdiv(B, TB), pl.cdiv(D, TD))

    data_spec = pl.BlockSpec((TB, TD), lambda i, j: (i, j))
    scale_spec = pl.BlockSpec((TB, 1), lambda i, j: (i, 0))

    if residual is None:
        kernel = _drop_path_kernel
        operands = (x2, scale2)
        in_specs = [data_spec, scale_spec]
        flops = B * D
        bytes_accessed = 2 * B * D * itemsize + B * itemsize
    else:
        kernel = _drop_path_residual_kernel
        r2 = residual.reshape(B, D).astype(x.dtype)
        operands = (x2, r2, scale2)
        in_specs = [data_spec, data_spec, scale_spec]
        flops = 2 * B * D
        bytes_accessed = 3 * B * D * itemsize + B * itemsize

    out = pl.pallas_call(
        kernel,
        out_shape=jax.ShapeDtypeStruct((B, D), x.dtype),
        grid_spec=pl.GridSpec(
            grid=grid,
            in_specs=in_specs,
            out_specs=data_spec,
        ),
        compiler_params=pltpu.CompilerParams(
            dimension_semantics=("parallel", "parallel"),
            vmem_limit_bytes=vmem_limit),
        cost_estimate=pl.CostEstimate(
            flops=flops, transcendentals=0, bytes_accessed=bytes_accessed),
    )(*operands)
    return out.reshape(x.shape)


class DropPath:
    """Drop paths (Stochastic Depth) per sample."""

    def __init__(self, drop_prob: float = 0.0, scale_by_keep: bool = True):
        self.drop_prob = drop_prob
        self.scale_by_keep = scale_by_keep
        self.training = True

    def __call__(self, x, seed=0, residual=None):
        key = jax.random.PRNGKey(seed)
        return drop_path_pallas(x, key, self.drop_prob, self.training,
                                self.scale_by_keep, residual=residual)


if __name__ == "__main__":
    key = jax.random.PRNGKey(0)
    B, C, H, W = 2, 4, 16, 16
    kx, kr = jax.random.split(key)
    x = jax.random.normal(kx, (B, C, H, W), dtype=jnp.float32)
    res = jax.random.normal(kr, (B, C, H, W), dtype=jnp.float32)

    drop_prob = 0.25
    keep_prob = 1.0 - drop_prob

    mod = DropPath(drop_prob=drop_prob, scale_by_keep=True)
    mod.training = True
    y = jax.block_until_ready(mod(x, seed=42))

    # Check DropPath semantics: every sample is either all-zeros (dropped)
    # or x / keep_prob (kept & rescaled).
    ok = True
    for b in range(B):
        yb = np.asarray(y[b])
        xb = np.asarray(x[b])
        dropped = np.allclose(yb, 0.0)
        kept = np.allclose(yb, xb / keep_prob, rtol=1e-5, atol=1e-5)
        ok = ok and (dropped or kept)

    # scale_by_keep=False path: every sample is either zeros or exactly x.
    mod_ns = DropPath(drop_prob=drop_prob, scale_by_keep=False)
    mod_ns.training = True
    y_ns = jax.block_until_ready(mod_ns(x, seed=7))
    for b in range(B):
        yb = np.asarray(y_ns[b])
        xb = np.asarray(x[b])
        ok = ok and (np.allclose(yb, 0.0) or
                     np.allclose(yb, xb, rtol=1e-5, atol=1e-5))

    # Eval / drop_prob==0 path must be identity.
    mod_eval = DropPath(drop_prob=drop_prob)
    mod_eval.training = False
    y_eval = jax.block_until_ready(mod_eval(x, seed=42))
    ok = ok and np.allclose(np.asarray(y_eval), np.asarray(x))

    # Fused residual path must equal residual + drop_path(x) for the same key.
    key42 = jax.random.PRNGKey(42)
    y_fused = jax.block_until_ready(
        drop_path_pallas(x, key42, drop_prob, True, True, residual=res))
    y_ref = np.asarray(res) + np.asarray(
        drop_path_pallas(x, key42, drop_prob, True, True))
    ok = ok and np.allclose(np.asarray(y_fused), y_ref, rtol=1e-5, atol=1e-5)

    assert ok, "DropPath semantics check failed"
    print("KERNEL_OK")
</pallas_src>

<mosaic_0001>
module attributes {stable_mosaic.version = 11 : i64} {
  func.func @_drop_path_kernel(%arg0: i32, %arg1: i32, %arg2: memref<8x512xf32, #tpu.memory_space<vmem>>, %arg3: memref<8x1xf32, #tpu.memory_space<vmem>>, %arg4: memref<8x512xf32, #tpu.memory_space<vmem>>) attributes {dimension_semantics = [#tpu.dimension_semantics<parallel>, #tpu.dimension_semantics<parallel>], iteration_bounds = array<i64: 1, 2>, scalar_prefetch = 0 : i64, scratch_operands = 0 : i64, tpu.core_type = #tpu.core_type<tc>, window_params = [{transform_indices = @transform_0, window_bounds = array<i64: 8, 512>}, {transform_indices = @transform_1, window_bounds = array<i64: 8, 1>}, {transform_indices = @transform_2, window_bounds = array<i64: 8, 512>}]} {
    %c0 = arith.constant 0 : index
    %c0_0 = arith.constant 0 : index
    %0 = vector.load %arg2[%c0, %c0_0] : memref<8x512xf32, #tpu.memory_space<vmem>>, vector<8x512xf32>
    %c0_1 = arith.constant 0 : index
    %c0_2 = arith.constant 0 : index
    %1 = vector.load %arg3[%c0_1, %c0_2] : memref<8x1xf32, #tpu.memory_space<vmem>>, vector<8x1xf32>
    %2 = vector.broadcast %1 : vector<8x1xf32> to vector<8x512xf32>
    %3 = arith.mulf %0, %2 : vector<8x512xf32>
    %c0_3 = arith.constant 0 : index
    %c0_4 = arith.constant 0 : index
    %4 = vector.load %arg4[%c0_3, %c0_4] : memref<8x512xf32, #tpu.memory_space<vmem>>, vector<8x512xf32>
    tpu.vector_store %arg4[%c0_3, %c0_4], %3 {strides = array<i32>} : memref<8x512xf32, #tpu.memory_space<vmem>>, vector<8x512xf32>,
    return
  }
  func.func @transform_0(%arg0: i32, %arg1: i32) -> (i32, i32) {
    %c0_i32 = arith.constant 0 : i32
    return %arg0, %arg1 : i32, i32
  }
  func.func @transform_1(%arg0: i32, %arg1: i32) -> (i32, i32) {
    %c0_i32 = arith.constant 0 : i32
    %c0_i32_0 = arith.constant 0 : i32
    return %arg0, %c0_i32 : i32, i32
  }
  func.func @transform_2(%arg0: i32, %arg1: i32) -> (i32, i32) {
    %c0_i32 = arith.constant 0 : i32
    return %arg0, %arg1 : i32, i32
  }
}

</mosaic_0001>

<bundles_post_ra>
// kernel: tpu_custom_call.1
= control target key start
LH: loop header
LB: loop body
LE: loop exit
PB: predicated region body
PF: predicated region fallthrough
CT: control target
= control target key end

     0   :  { %7 = vsyncpa [#allocation3], 0  ;;  %s730_s0 = inlined_call_operand.hbm [shape: f32[2,1024], index: 0, kind: input, shape index: {}]   ;;  %s731_s1 = inlined_call_operand.vmem [shape: f32[2,1], index: 1, kind: input, shape index: {}]   ;;  %s732_s2 = inlined_call_operand.hbm [shape: f32[2,1024], index: 2, kind: output, shape index: {}]  }
   0x1   :  { %9 = vsyncpa [#allocation3 + $0x1], 0 }
   0x2   :  { %10 = vsyncpa [#allocation4], 0 }
   0x3   :  { %12 = vsyncpa [#allocation4 + $0x1], 0  ;;  %s610_s9 = smov 0   ;;  %s612_s10 = smov 0  }
   0x4   :  { %s614_s11 = smov 0   ;;  %s616_s12 = smov 0  }
   0x5   :  { %s618_s13 = smov 0   ;;  %s620_s14 = smov 0  }
   0x6 LB: > { %s395_s15 = sadd.s32 4294967295, %s582_s14   ;;  %s396_s16 = sadd.s32 4294967294, %s582_s14   ;;  %s582_s14 = sphi %s620_s14, %s18_s14   ;;  %s578_s13 = sphi %s618_s13, %s740_s13   ;;  %s574_s12 = sphi %s616_s12, %s739_s12   ;;  %s570_s11 = sphi %s614_s11, %s738_s11   ;;  %s566_s10 = sphi %s612_s10, %s737_s10   ;;  %s562_s9 = sphi %s610_s9, %s736_s9  }
   0x7   : > { %s27_s17 = sadd.s32 1, %s578_s13  ;;  %s39_s18 = sadd.s32 1, %s570_s11 }
   0x8   : > { %p28_p0 = scmp.ge.s32.totalorder %s27_s17, 2  ;;  %p46_p1 = scmp.ne.s32.totalorder %s570_s11, %s566_s10 }
   0x9   : > { %p47_p2 = scmp.eq.s32.totalorder %s582_s14, 0  ;;  %p52_p3 = scmp.ne.s32.totalorder %s566_s10, %s562_s9 }
   0xa   : > { %s742_s17 = smov (%p28_p0, %s27_s17), 0  ;;  %p53_p5 = scmp.eq.s32.totalorder %s395_s15, 0 }
   0xb   : > { %p48_p4 = por %p47_p2, %p46_p1  ;;  %s35_s19 = ssub.s32 %s578_s13, %s742_s17 }
   0xc   : > { %p104_p6 = scmp.eq.s32.totalorder %s395_s15, 1  ;;  %p37_p7 = scmp.eq.s32.totalorder %s35_s19, 0 }
   0xd   : > { %p653_p8 = por %p53_p5, %p52_p3  ;;  %p110_p10 = scmp.eq.s32.totalorder %s396_s16, 1 }
   0xe   : > { %p657_p9 = por %p104_p6, %p46_p1  ;;  %p399_p12 = scmp.ge.s32.totalorder %s582_s14, 2 }
   0xf   : > { %s662_s22 = scalar_select %p37_p7, %s570_s11, %s39_s18  }
  0x10   : > { %p664_p11 = por %p110_p10, %p52_p3  ;;  %139 = sbr.rel (%p399_p12) target bundleno = 31 (0x1f), region = 20 }
  0x15   : > { %142 = sbr.rel (!%p48_p4) target bundleno = 31 (0x1f), region = 24  ;;  %s143_s24 = sand.u32 (%p48_p4), 1, %s570_s11  }
  0x16   : > { %s400_s25 = sshll.u32 (%p48_p4), %s143_s24, 5  ;;  %s144_s26 = scalar_lea.sflag (%p48_p4), [#allocation3], %s143_s24 }
  0x17   : > { %s147_s27 = scalar_lea.vmem (%p48_p4), [#allocation2], %s400_s25 }
  0x1a   : > { %155 = vsyncadd %s144_s26, 384  ;;  %s411_s28 = sshll.u32 %s578_s13, 3  ;;  %s164_s29 = sshll.u32 %s147_s27, 4  ;;  %s165_s29 = int_to_ptr.vmem [resolvable:$true] %s164_s29 }
  0x1b   : > { %s160_s4 = scalar_lea.hbm %s730_s0, %s411_s28  ;;  %s584_s6 = smov 256  }
  0x1c   : > { %s162_s5 = sshll.u32 %s160_s4, 4  ;;  %s585_s7 = smov 128   ;;  %s163_s5 = int_to_ptr.hbm [resolvable:$true] %s162_s5 }
  0x1d   : > { %s586_s8 = smov 8  }
  0x1e   : > { %170 = dma.hbm_to_vmem [thread:$0]  %s163_s5, 128, %s165_s29, %s144_s26, %s584_s6, %s585_s7, %s586_s8  }
  0x1f PF: > { %p403_p13 = scmp.ge.s32.totalorder %s582_s14, 1  ;;  %p172_p0 = scmp.lt.s32.totalorder %s582_s14, 3 }
  0x21   : > { %p173_p1 = pnand %p403_p13, %p172_p0 }
  0x22   : > { %s679_s15 = sand.u32 (!%p173_p1), 1, %s566_s10  }
  0x23   : > { %176 = sbr.rel (%p173_p1) target bundleno = 181 (0xb5), region = 28  ;;  %s404_s16 = sshll.u32 (!%p173_p1), %s679_s15, 5 }
  0x24   : > { %s179_s18 = scalar_lea.sflag (!%p173_p1), [#allocation3], %s679_s15  ;;  %s182_s19 = scalar_lea.vmem (!%p173_p1), [#allocation2], %s404_s16 }
  0x28   : > { %553 = dma.done.wait (%p653_p8), %s179_s18, 512  }
  0x29   : > { %555 = vsyncadd (%p653_p8), %s179_s18, 4294966784  ;;  %v587_v0 = vmov 0   ;;  %v235_v1 = vld [vmem:[%s731_s1] sm:$0xff]  ;;  %v588_v2 = vmov 269488144   ;;  %v232_v16 = vld [vmem:[%s182_s19 + $0x8] sm:$0xff] }
  0x2a   : > { %479 = vset.pattern.permute.xlu0 %v587_v0  ;;  %v241_v3 = vunpack.c.l.s4 %v588_v2  ;;  %v589_v4 = vmov 842150450   ;;  %v590_v6 = vmov 1414812756   ;;  %v591_v8 = vmov 1987475062  }
  0x2b   : > { %238 = vperm.xlu0 %479, %v235_v1   ;;  %v245_v5 = vunpack.c.l.s4 %v589_v4  ;;  %v249_v7 = vunpack.c.l.s4 %v590_v6  ;;  %v253_v9 = vunpack.c.l.s4 %v591_v8  ;;  %v231_v15 = vld [vmem:[%s182_s19] sm:$0xff]  ;;  %v233_v17 = vld [vmem:[%s182_s19 + $0x10] sm:$0xff]  ;;  %v234_v18 = vld [vmem:[%s182_s19 + $0x18] sm:$0xff]  ;;  %s210_s20 = scalar_lea.vmem [#allocation5], %s404_s16  ;;  %s269_s26 = scalar_lea.sflag [#allocation4], %s679_s15 }
  0x2c   : > { %v242_v10 = vunpack.c.0.s8 %v241_v3 }
  0x2d   : > { %v246_v11 = vunpack.c.0.s8 %v245_v5  ;;  %v250_v12 = vunpack.c.0.s8 %v249_v7  ;;  %v254_v13 = vunpack.c.0.s8 %v253_v9 }
  0x9d   : > { %v239_v14 = vpop.permute.xlu0 %238 }
  0x9e   : > { %v243_v19 = vperm.slane %v239_v14, %v242_v10  ;;  %v247_v20 = vperm.slane %v239_v14, %v246_v11  ;;  %v251_v21 = vperm.slane %v239_v14, %v250_v12  ;;  %v255_v22 = vperm.slane %v239_v14, %v254_v13 }
  0xa0   : > { %v260_v23 = vmul.f32 %v243_v19, %v231_v15  ;;  %v261_v24 = vmul.f32 %v247_v20, %v232_v16  ;;  %v262_v25 = vmul.f32 %v251_v21, %v233_v17  ;;  %v263_v26 = vmul.f32 %v255_v22, %v234_v18 }
  0xa1   : > { %275 = sbr.rel (!%p657_p9) target bundleno = 181 (0xb5), region = 36 }
  0xa2   : > { %264 = vst [vmem:[%s210_s20] sm:$0xff] %v260_v23 }
  0xa3   : > { %265 = vst [vmem:[%s210_s20 + $0x8] sm:$0xff] %v261_v24 }
  0xa4   : > { %266 = vst [vmem:[%s210_s20 + $0x10] sm:$0xff] %v262_v25 }
  0xa5   : > { %267 = vst [vmem:[%s210_s20 + $0x18] sm:$0xff] %v263_v26 }
  0xa6   : > { %283 = vsyncadd %s269_s26, 384  ;;  %s412_s27 = sshll.u32 %s574_s12, 3  ;;  %s290_s28 = sshll.u32 %s210_s20, 4  ;;  %s291_s28 = int_to_ptr.vmem [resolvable:$true] %s290_s28 }
  0xa7   : > { %s288_s3 = scalar_lea.hbm %s732_s2, %s412_s27  ;;  %s520_s21 = scalar_lea.hbm %s732_s2, 16 }
  0xa8   : > { %s292_s4 = sshll.u32 %s288_s3, 4  ;;  %s293_s4 = int_to_ptr.hbm [resolvable:$true] %s292_s4 }
  0xa9   : > { %s516_s5 = sshra.s32 %s293_s4, 4  ;;  %s517_s5 = int_to_ptr.hbm [resolvable:$true] %s516_s5 }
  0xaa   : > { %s518_s6 = scalar_lea.hbm %s517_s5, 8  ;;  %p521_p3 = scmp.lt.s32.totalorder %s517_s5, %s732_s2 }
  0xab   : > { %p519_p2 = scmp.ne.s32.totalorder %s517_s5, %s518_s6  ;;  %p522_p4 = scmp.lt.s32.totalorder %s520_s21, %s518_s6 }
  0xad   : > { %p523_p5 = por %p522_p4, %p521_p3 }
  0xaf   : > { %p524_p6 = pnand %p523_p5, %p519_p2 }
  0xb1   : > { %527 = shalt.err (!%p524_p6)
}
  0xb2   : > { %s592_s12 = smov 128   ;;  %s593_s18 = smov 256  }
  0xb3   : > { %s594_s19 = smov 8  }
  0xb4   : > { %298 = dma.vmem_to_hbm [thread:$0]  %s291_s28, 128, %s293_s4, %s269_s26, %s592_s12, %s593_s18, %s594_s19  }
  0xb5 PF: > { %s307_s24 = sand.u32 1, %s562_s9   ;;  %p416_p7 = pnand %p399_p12, %p664_p11 }
  0xb6   : > { %s308_s25 = scalar_lea.sflag [#allocation4], %s307_s24 }
  0xb7   : > { %p417_p8 = pneg %p416_p7 }
  0xb9   : > { %557 = dma.done.wait (%p417_p8), %s308_s25, 512  }
  0xba   : > { %559 = vsyncadd (%p417_p8), %s308_s25, 4294966784  ;;  %s18_s14 = sadd.s32 1, %s582_s14   ;;  %s736_s9 = smov %s566_s10 }
  0xbb   : > { %p15_p9 = scmp.ge.s32.totalorder %s18_s14, 4   ;;  %s737_s10 = smov %s570_s11 }
  0xbc   : > { %s738_s11 = smov %s662_s22  ;;  %s739_s12 = smov %s578_s13 }
  0xbd   : > { %s740_s13 = smov %s742_s17  ;;  %17 = sbr.rel (!%p15_p9) target bundleno = 6 (0x6), region = 76 }
  0xc2   :  { %314 = vsyncpa [#allocation3], 1 }
  0xc3   :  { %316 = vsyncpa [#allocation3 + $0x1], 1 }
  0xc4   :  { %317 = vsyncpa [#allocation4], 1 }
  0xc5   :  { %319 = vsyncpa [#allocation4 + $0x1], 1 }

</bundles_post_ra>
